<compile_context>
chip_gen: v7x
topology: tpu7x:2x2x1
jax: 0.10.0
libtpu: 0.0.40
codegen_flags: <defaults>
</compile_context>

<pallas_src>
import functools
import math

import jax
import jax.numpy as jnp
from jax.experimental import pallas as pl
from jax.experimental.pallas import tpu as pltpu


# --------------------------- VMEM / tiling policy ---------------------------

def _vmem_limit_bytes():
    """Scoped-VMEM request sized per generation: ~48 MiB on v7x (64 MiB phys),
    96 MiB on v6e/v5e (128 MiB phys). Conservative fallback if the query fails."""
    try:
        cap = pltpu.get_tpu_info().vmem_capacity_bytes
    except Exception:
        return 48 * 1024 * 1024
    return min(int(cap * 3 // 4), 96 * 1024 * 1024)


VMEM_LIMIT = _vmem_limit_bytes()


def _pick_tm(M, max_rows=256):
    """Row (token) tile. Full extent for small M; otherwise a fixed 256-row tile
    (multiple of 16 so bf16 packed rows fill sublanes) and the caller pads M up
    to a multiple of it. 256 keeps double-buffered (tm,H)+(tm,I) activation
    tiles inside v7x's 64 MiB; v6e/v5e could go larger."""
    if M <= max_rows:
        return M
    return max_rows


def _compiler_params():
    return pltpu.CompilerParams(
        dimension_semantics=("parallel",),
        vmem_limit_bytes=VMEM_LIMIT,
    )


# Single-buffer resident operands (constant index_map across the grid) when the
# installed jax exposes BlockSpec(pipeline_mode=...). Default double-buffering
# allocates 2 VMEM buffers even for blocks that never change; Buffered(1)
# halves the weight footprint (critical headroom on v7x).
_USE_SINGLE_BUFFERED_RESIDENT = hasattr(pl, "Buffered")


def _resident_spec(shape, index_map):
    if _USE_SINGLE_BUFFERED_RESIDENT:
        return pl.BlockSpec(shape, index_map, pipeline_mode=pl.Buffered(1))
    return pl.BlockSpec(shape, index_map)


# ----------------------------- Pallas kernels ------------------------------

def _emb_ln_kernel(we_ref, pe_ref, te_ref, g_ref, b_ref, o_ref, *, eps):
    """Sum of the three gathered embeddings + LayerNorm, fused (no f32 emb in HBM)."""
    x = (we_ref[...].astype(jnp.float32)
         + pe_ref[...].astype(jnp.float32)
         + te_ref[...].astype(jnp.float32))                     # (S, H) f32
    mu = jnp.mean(x, axis=-1, keepdims=True)
    var = jnp.mean(jnp.square(x - mu), axis=-1, keepdims=True)
    y = (x - mu) * jax.lax.rsqrt(var + eps)
    o_ref[...] = (y * g_ref[...] + b_ref[...]).astype(o_ref.dtype)


def embed_layernorm(word_e, pos_e, type_e, gamma, beta, eps=1e-12,
                    out_dtype=jnp.bfloat16):
    B, S, H = word_e.shape
    kernel = functools.partial(_emb_ln_kernel, eps=eps)
    return pl.pallas_call(
        kernel,
        out_shape=jax.ShapeDtypeStruct((B, S, H), out_dtype),
        grid=(B,),
        in_specs=[
            pl.BlockSpec((pl.Squeezed(), S, H), lambda b: (b, 0, 0)),
            _resident_spec((S, H), lambda b: (0, 0)),            # pos table, resident
            pl.BlockSpec((pl.Squeezed(), S, H), lambda b: (b, 0, 0)),
            _resident_spec((1, H), lambda b: (0, 0)),
            _resident_spec((1, H), lambda b: (0, 0)),
        ],
        out_specs=pl.BlockSpec((pl.Squeezed(), S, H), lambda b: (b, 0, 0)),
        compiler_params=_compiler_params(),
    )(word_e, pos_e, type_e, gamma.reshape(1, H), beta.reshape(1, H))


def _attn_block_kernel(h_ref, bias_ref, wqkv_ref, bqkv_ref, wo_ref, bo_ref,
                       g_ref, be_ref, o_ref, qkv_scr, ctx_scr,
                       *, num_heads, head_dim, scale, eps):
    """Whole attention sub-layer for one batch element.

    qkv (S,3H) and ctx (S,H) only ever live in VMEM scratch; the output store
    is a single lane-dense (S,H) write after the fused LN epilogue."""
    H = num_heads * head_dim
    h_b = h_ref[...]                                            # (S, H) bf16

    # 1) fused QKV projection: one K=H contraction, 3H-wide output (MXU-friendly).
    qkv = jnp.dot(h_b, wqkv_ref[...], preferred_element_type=jnp.float32)
    qkv_scr[...] = (qkv + bqkv_ref[...]).astype(qkv_scr.dtype)
    bias = bias_ref[...].astype(jnp.float32)                    # (1, S) key mask

    # 2) heads: stream each head's context straight into ctx_scr (no concat,
    #    no accumulated list of live score/context tiles).
    # TODO(synk): for many-head / long-sequence configs (>=8 heads, S>=512)
    # switch to a lax.fori_loop over a head-major qkv scratch with 128-lane
    # aligned head groups and an online (flash-style) softmax over KV blocks;
    # on v7x also grid over (B, head_group) for the 2 TensorCores.
    for h in range(num_heads):
        lo = h * head_dim
        q_h = qkv_scr[:, lo:lo + head_dim]                      # (S, Dh) bf16
        k_h = qkv_scr[:, H + lo:H + lo + head_dim]
        v_h = qkv_scr[:, 2 * H + lo:2 * H + lo + head_dim]
        # q @ k^T without an explicit transpose: contract the last dims.
        s = jax.lax.dot_general(q_h, k_h, (((1,), (1,)), ((), ())),
                                preferred_element_type=jnp.float32)   # (S, S)
        s = s * scale + bias
        m = jnp.max(s, axis=-1, keepdims=True)
        e = jnp.exp(s - m)
        l = jnp.sum(e, axis=-1, keepdims=True)
        p = e * pl.reciprocal(l, approx=True)                   # EUP divide
        ctx_scr[:, lo:lo + head_dim] = jnp.dot(
            p.astype(v_h.dtype), v_h,
            preferred_element_type=jnp.float32).astype(ctx_scr.dtype)

    # 3) output projection (fused K=H matmul) + bias + residual + LayerNorm.
    y = jnp.dot(ctx_scr[...], wo_ref[...], preferred_element_type=jnp.float32)
    y = y + bo_ref[...] + h_b.astype(jnp.float32)
    mu = jnp.mean(y, axis=-1, keepdims=True)
    var = jnp.mean(jnp.square(y - mu), axis=-1, keepdims=True)
    y = (y - mu) * jax.lax.rsqrt(var + eps)
    o_ref[...] = (y * g_ref[...] + be_ref[...]).astype(o_ref.dtype)


def attention_block(h, bias, w_qkv, b_qkv, wo, bo, gamma, beta,
                    num_heads, head_dim, eps=1e-12):
    """h: (B,S,H) bf16; bias: (B,1,S) additive key mask. Returns (B,S,H) bf16."""
    B, S, H = h.shape
    H3 = 3 * H
    kernel = functools.partial(
        _attn_block_kernel, num_heads=num_heads, head_dim=head_dim,
        scale=1.0 / math.sqrt(head_dim), eps=eps)
    return pl.pallas_call(
        kernel,
        out_shape=jax.ShapeDtypeStruct((B, S, H), h.dtype),
        grid=(B,),
        in_specs=[
            pl.BlockSpec((pl.Squeezed(), S, H), lambda b: (b, 0, 0)),
            pl.BlockSpec((pl.Squeezed(), 1, S), lambda b: (b, 0, 0)),
            _resident_spec((H, H3), lambda b: (0, 0)),
            _resident_spec((1, H3), lambda b: (0, 0)),
            _resident_spec((H, H), lambda b: (0, 0)),
            _resident_spec((1, H), lambda b: (0, 0)),
            _resident_spec((1, H), lambda b: (0, 0)),
            _resident_spec((1, H), lambda b: (0, 0)),
        ],
        out_specs=pl.BlockSpec((pl.Squeezed(), S, H), lambda b: (b, 0, 0)),
        scratch_shapes=[
            pltpu.VMEM((S, H3), jnp.bfloat16),   # fused qkv (never hits HBM)
            pltpu.VMEM((S, H), jnp.bfloat16),    # merged-head context
        ],
        compiler_params=_compiler_params(),
    )(h, bias, w_qkv, b_qkv.reshape(1, H3), wo, bo.reshape(1, H),
      gamma.reshape(1, H), beta.reshape(1, H))


def _ffn_block_kernel(x_ref, w1_ref, b1_ref, w2_ref, b2_ref, g_ref, be_ref,
                      o_ref, *, eps):
    """Fused FFN: gelu(x@w1+b1)@w2+b2 + residual -> LayerNorm (no HBM trip for
    the intermediate (tm,I) activation)."""
    x = x_ref[...]                                              # (tm, H) bf16
    ff = jnp.dot(x, w1_ref[...], preferred_element_type=jnp.float32) + b1_ref[...]
    ff = jax.nn.gelu(ff, approximate=False)                     # exact (erf) GELU, f32
    y = jnp.dot(ff.astype(x.dtype), w2_ref[...],
                preferred_element_type=jnp.float32)
    y = y + b2_ref[...] + x.astype(jnp.float32)                 # bias + residual
    mu = jnp.mean(y, axis=-1, keepdims=True)
    var = jnp.mean(jnp.square(y - mu), axis=-1, keepdims=True)
    y = (y - mu) * jax.lax.rsqrt(var + eps)
    o_ref[...] = (y * g_ref[...] + be_ref[...]).astype(o_ref.dtype)


def ffn_block(x, w1, b1, w2, b2, gamma, beta, eps=1e-12):
    """x: (M,H) bf16. Row-tiled grid; both FFN weights resident across tiles."""
    M, H = x.shape
    I = w1.shape[1]
    tm = _pick_tm(M)
    Mp = -(-M // tm) * tm                     # pad rows instead of one huge block
    xp = x if Mp == M else jnp.pad(x, ((0, Mp - M), (0, 0)))
    kernel = functools.partial(_ffn_block_kernel, eps=eps)
    out = pl.pallas_call(
        kernel,
        out_shape=jax.ShapeDtypeStruct((Mp, H), x.dtype),
        grid=(Mp // tm,),
        in_specs=[
            pl.BlockSpec((tm, H), lambda i: (i, 0)),
            _resident_spec((H, I), lambda i: (0, 0)),
            _resident_spec((1, I), lambda i: (0, 0)),
            _resident_spec((I, H), lambda i: (0, 0)),
            _resident_spec((1, H), lambda i: (0, 0)),
            _resident_spec((1, H), lambda i: (0, 0)),
            _resident_spec((1, H), lambda i: (0, 0)),
        ],
        out_specs=pl.BlockSpec((tm, H), lambda i: (i, 0)),
        compiler_params=_compiler_params(),
    )(xp, w1, b1.reshape(1, I), w2, b2.reshape(1, H),
      gamma.reshape(1, H), beta.reshape(1, H))
    return out if Mp == M else out[:M]


# --------------------------- model (glue + kernels) -------------------------

CFG = dict(
    vocab_size=100,
    hidden=32,
    num_layers=2,
    num_heads=2,
    intermediate=64,
    max_pos=16,
    type_vocab=2,
)


def init_params(key, cfg):
    """Deterministic synthetic BERT weights (std=0.02 normals, zero biases), f32."""
    H, I = cfg["hidden"], cfg["intermediate"]
    keys = iter(jax.random.split(key, 64))
    n = lambda shape: (0.02 * jax.random.normal(next(keys), shape)).astype(jnp.float32)
    params = {
        "word_emb": n((cfg["vocab_size"], H)),
        "pos_emb": n((cfg["max_pos"], H)),
        "type_emb": n((cfg["type_vocab"], H)),
        "emb_ln_g": jnp.ones((H,), jnp.float32),
        "emb_ln_b": jnp.zeros((H,), jnp.float32),
        "layers": [],
    }
    for _ in range(cfg["num_layers"]):
        params["layers"].append({
            "wq": n((H, H)), "bq": jnp.zeros((H,), jnp.float32),
            "wk": n((H, H)), "bk": jnp.zeros((H,), jnp.float32),
            "wv": n((H, H)), "bv": jnp.zeros((H,), jnp.float32),
            "wo": n((H, H)), "bo": jnp.zeros((H,), jnp.float32),
            "ln1_g": jnp.ones((H,), jnp.float32),
            "ln1_b": jnp.zeros((H,), jnp.float32),
            "w1": n((H, I)), "b1": jnp.zeros((I,), jnp.float32),
            "w2": n((I, H)), "b2": jnp.zeros((H,), jnp.float32),
            "ln2_g": jnp.ones((H,), jnp.float32),
            "ln2_b": jnp.zeros((H,), jnp.float32),
        })
    return params


def prepare_kernel_params(params):
    """Kernel-side params: fused bf16 QKV weight, bf16 matmul weights,
    f32 biases / LayerNorm params / embedding tables."""
    bf = lambda a: a.astype(jnp.bfloat16)
    kp = {
        "word_emb": params["word_emb"],
        "pos_emb": params["pos_emb"],
        "type_emb": params["type_emb"],
        "emb_ln_g": params["emb_ln_g"],
        "emb_ln_b": params["emb_ln_b"],
        "layers": [],
    }
    for lyr in params["layers"]:
        kp["layers"].append({
            "w_qkv": bf(jnp.concatenate([lyr["wq"], lyr["wk"], lyr["wv"]], axis=1)),
            "b_qkv": jnp.concatenate([lyr["bq"], lyr["bk"], lyr["bv"]]),
            "wo": bf(lyr["wo"]), "bo": lyr["bo"],
            "w1": bf(lyr["w1"]), "b1": lyr["b1"],
            "w2": bf(lyr["w2"]), "b2": lyr["b2"],
            "ln1_g": lyr["ln1_g"], "ln1_b": lyr["ln1_b"],
            "ln2_g": lyr["ln2_g"], "ln2_b": lyr["ln2_b"],
        })
    return kp


def m3e_forward(kparams, input_ids, attention_mask, token_type_ids, cfg):
    """BERT encoder forward; returns last_hidden_state[:, 0] (pooling='cls')."""
    B, S = input_ids.shape
    H = cfg["hidden"]
    Hh = cfg["num_heads"]
    Dh = H // Hh

    # --- embeddings: gathers are plain-JAX glue; sum + LN fused in one kernel ---
    word_e = kparams["word_emb"][input_ids]                       # (B,S,H) f32
    type_e = kparams["type_emb"][token_type_ids]                  # (B,S,H) f32
    pos_e = kparams["pos_emb"][:S]                                # (S,H)   f32
    h = embed_layernorm(word_e, pos_e, type_e,
                        kparams["emb_ln_g"], kparams["emb_ln_b"])  # (B,S,H) bf16

    # additive attention bias from padding mask, shape (B,1,S)
    bias = ((1.0 - attention_mask.astype(jnp.float32)) * -1e9)[:, None, :]

    for lyr in kparams["layers"]:
        # attention sub-layer: QKV + attention + out-proj + residual + LN, one call
        h = attention_block(h, bias, lyr["w_qkv"], lyr["b_qkv"],
                            lyr["wo"], lyr["bo"], lyr["ln1_g"], lyr["ln1_b"],
                            Hh, Dh)                                # (B,S,H) bf16
        # FFN sub-layer: dense+GELU+dense + residual + LN, one call
        h = ffn_block(h.reshape(B * S, H), lyr["w1"], lyr["b1"],
                      lyr["w2"], lyr["b2"], lyr["ln2_g"], lyr["ln2_b"]
                      ).reshape(B, S, H)

    return h[:, 0].astype(jnp.float32)                            # pooling='cls'


def run_forward(kparams, input_ids, attention_mask, token_type_ids, cfg):
    """Run the Pallas forward; if this Mosaic build rejects single-buffered
    resident operands (pipeline_mode=pl.Buffered(1)), retry with defaults."""
    global _USE_SINGLE_BUFFERED_RESIDENT
    try:
        out = m3e_forward(kparams, input_ids, attention_mask, token_type_ids, cfg)
        return jax.block_until_ready(out)
    except Exception:
        if not _USE_SINGLE_BUFFERED_RESIDENT:
            raise
        _USE_SINGLE_BUFFERED_RESIDENT = False
        out = m3e_forward(kparams, input_ids, attention_mask, token_type_ids, cfg)
        return jax.block_until_ready(out)


# ------------------------------ pure-JAX reference ---------------------------

def m3e_forward_ref(params, input_ids, attention_mask, token_type_ids, cfg):
    B, S = input_ids.shape
    H = cfg["hidden"]
    Hh = cfg["num_heads"]
    Dh = H // Hh

    def ln(x, g, b, eps=1e-12):
        mu = jnp.mean(x, -1, keepdims=True)
        var = jnp.mean(jnp.square(x - mu), -1, keepdims=True)
        return (x - mu) * jax.lax.rsqrt(var + eps) * g + b

    emb = (params["word_emb"][input_ids]
           + params["pos_emb"][:S][None, :, :]
           + params["type_emb"][token_type_ids])
    h = ln(emb.astype(jnp.float32), params["emb_ln_g"], params["emb_ln_b"])
    bias = ((1.0 - attention_mask.astype(jnp.float32)) * -1e9)[:, None, None, :]

    for lyr in params["layers"]:
        def proj(w, b):
            return (h @ w + b).reshape(B, S, Hh, Dh).transpose(0, 2, 1, 3)
        q, k, v = proj(lyr["wq"], lyr["bq"]), proj(lyr["wk"], lyr["bk"]), proj(lyr["wv"], lyr["bv"])
        s = jnp.einsum("bhqd,bhkd->bhqk", q, k) / math.sqrt(Dh) + bias
        p = jax.nn.softmax(s, -1)
        ctx = jnp.einsum("bhqk,bhkd->bhqd", p, v).transpose(0, 2, 1, 3).reshape(B, S, H)
        h = ln(ctx @ lyr["wo"] + lyr["bo"] + h, lyr["ln1_g"], lyr["ln1_b"])
        ff = jax.nn.gelu(h @ lyr["w1"] + lyr["b1"], approximate=False)
        h = ln(ff @ lyr["w2"] + lyr["b2"] + h, lyr["ln2_g"], lyr["ln2_b"])
    return h[:, 0]


# ----------------------------------- main ------------------------------------

if __name__ == "__main__":
    B, S = 2, 8
    key = jax.random.PRNGKey(0)
    k_param, k_ids, k_tt = jax.random.split(key, 3)

    params = init_params(k_param, CFG)
    kparams = prepare_kernel_params(params)

    input_ids = jax.random.randint(k_ids, (B, S), 0, CFG["vocab_size"], dtype=jnp.int32)
    token_type_ids = jax.random.randint(k_tt, (B, S), 0, CFG["type_vocab"], dtype=jnp.int32)
    # second sequence has 2 padding positions
    attention_mask = jnp.array([[1] * S, [1] * (S - 2) + [0] * 2], dtype=jnp.int32)

    out = run_forward(kparams, input_ids, attention_mask, token_type_ids, CFG)
    assert out.shape == (B, CFG["hidden"]), out.shape

    ref = m3e_forward_ref(params, input_ids, attention_mask, token_type_ids, CFG)
    assert jnp.allclose(out, ref, rtol=5e-2, atol=5e-2), (
        "mismatch vs pure-JAX reference: max abs err = "
        f"{float(jnp.max(jnp.abs(out - ref)))}")

    print("KERNEL_OK")
</pallas_src>

<mosaic_0001>
module attributes {stable_mosaic.version = 11 : i64} {
  func.func @_emb_ln_kernel(%arg0: i32, %arg1: memref<1x8x32xf32, #tpu.memory_space<vmem>>, %arg2: memref<8x32xf32, #tpu.memory_space<vmem>>, %arg3: memref<1x8x32xf32, #tpu.memory_space<vmem>>, %arg4: memref<1x32xf32, #tpu.memory_space<vmem>>, %arg5: memref<1x32xf32, #tpu.memory_space<vmem>>, %arg6: memref<1x8x32xbf16, #tpu.memory_space<vmem>>) attributes {dimension_semantics = [#tpu.dimension_semantics<parallel>], iteration_bounds = array<i64: 2>, scalar_prefetch = 0 : i64, scratch_operands = 0 : i64, tpu.core_type = #tpu.core_type<tc>, window_params = [{transform_indices = @transform_0, window_bounds = array<i64: 1, 8, 32>}, {pipeline_mode = #tpu.pipeline_mode<synchronous>, transform_indices = @transform_1, window_bounds = array<i64: 8, 32>}, {transform_indices = @transform_2, window_bounds = array<i64: 1, 8, 32>}, {pipeline_mode = #tpu.pipeline_mode<synchronous>, transform_indices = @transform_3, window_bounds = array<i64: 1, 32>}, {pipeline_mode = #tpu.pipeline_mode<synchronous>, transform_indices = @transform_4, window_bounds = array<i64: 1, 32>}, {transform_indices = @transform_5, window_bounds = array<i64: 1, 8, 32>}]} {
    %c0 = arith.constant 0 : index
    %c0_0 = arith.constant 0 : index
    %c0_1 = arith.constant 0 : index
    %0 = vector.load %arg1[%c0, %c0_0, %c0_1] : memref<1x8x32xf32, #tpu.memory_space<vmem>>, vector<1x8x32xf32>
    %1 = vector.shape_cast %0 : vector<1x8x32xf32> to vector<8x32xf32>
    %c0_2 = arith.constant 0 : index
    %c0_3 = arith.constant 0 : index
    %2 = vector.load %arg2[%c0_2, %c0_3] : memref<8x32xf32, #tpu.memory_space<vmem>>, vector<8x32xf32>
    %3 = arith.addf %1, %2 : vector<8x32xf32>
    %c0_4 = arith.constant 0 : index
    %c0_5 = arith.constant 0 : index
    %c0_6 = arith.constant 0 : index
    %4 = vector.load %arg3[%c0_4, %c0_5, %c0_6] : memref<1x8x32xf32, #tpu.memory_space<vmem>>, vector<1x8x32xf32>
    %5 = vector.shape_cast %4 : vector<1x8x32xf32> to vector<8x32xf32>
    %6 = arith.addf %3, %5 : vector<8x32xf32>
    %cst = arith.constant dense<0.000000e+00> : vector<8xf32>
    %7 = vector.multi_reduction <add>, %6, %cst [1] : vector<8x32xf32> to vector<8xf32>
    %8 = vector.shape_cast %7 : vector<8xf32> to vector<8x1xf32>
    %cst_7 = arith.constant 3.200000e+01 : f32
    %9 = vector.broadcast %cst_7 : f32 to vector<8x1xf32>
    %10 = arith.divf %8, %9 : vector<8x1xf32>
    %11 = vector.broadcast %10 : vector<8x1xf32> to vector<8x32xf32>
    %12 = arith.subf %6, %11 : vector<8x32xf32>
    %13 = arith.mulf %12, %12 : vector<8x32xf32>
    %cst_8 = arith.constant dense<0.000000e+00> : vector<8xf32>
    %14 = vector.multi_reduction <add>, %13, %cst_8 [1] : vector<8x32xf32> to vector<8xf32>
    %15 = vector.shape_cast %14 : vector<8xf32> to vector<8x1xf32>
    %cst_9 = arith.constant 3.200000e+01 : f32
    %16 = vector.broadcast %cst_9 : f32 to vector<8x1xf32>
    %17 = arith.divf %15, %16 : vector<8x1xf32>
    %18 = vector.broadcast %10 : vector<8x1xf32> to vector<8x32xf32>
    %19 = arith.subf %6, %18 : vector<8x32xf32>
    %cst_10 = arith.constant 9.99999996E-13 : f32
    %20 = vector.broadcast %cst_10 : f32 to vector<8x1xf32>
    %21 = arith.addf %17, %20 : vector<8x1xf32>
    %22 = math.rsqrt %21 : vector<8x1xf32>
    %23 = vector.broadcast %22 : vector<8x1xf32> to vector<8x32xf32>
    %24 = arith.mulf %19, %23 : vector<8x32xf32>
    %c0_11 = arith.constant 0 : index
    %c0_12 = arith.constant 0 : index
    %25 = vector.load %arg4[%c0_11, %c0_12] : memref<1x32xf32, #tpu.memory_space<vmem>>, vector<1x32xf32>
    %26 = vector.broadcast %25 : vector<1x32xf32> to vector<8x32xf32>
    %27 = arith.mulf %24, %26 : vector<8x32xf32>
    %c0_13 = arith.constant 0 : index
    %c0_14 = arith.constant 0 : index
    %28 = vector.load %arg5[%c0_13, %c0_14] : memref<1x32xf32, #tpu.memory_space<vmem>>, vector<1x32xf32>
    %29 = vector.broadcast %28 : vector<1x32xf32> to vector<8x32xf32>
    %30 = arith.addf %27, %29 : vector<8x32xf32>
    %31 = arith.truncf %30 : vector<8x32xf32> to vector<8x32xbf16>
    %c0_15 = arith.constant 0 : index
    %c0_16 = arith.constant 0 : index
    %c0_17 = arith.constant 0 : index
    %32 = vector.load %arg6[%c0_15, %c0_16, %c0_17] : memref<1x8x32xbf16, #tpu.memory_space<vmem>>, vector<1x8x32xbf16>
    %33 = vector.shape_cast %32 : vector<1x8x32xbf16> to vector<8x32xbf16>
    %34 = vector.shape_cast %31 : vector<8x32xbf16> to vector<1x8x32xbf16>
    tpu.vector_store %arg6[%c0_15, %c0_16, %c0_17], %34 {strides = array<i32>} : memref<1x8x32xbf16, #tpu.memory_space<vmem>>, vector<1x8x32xbf16>,
    return
  }
  func.func @transform_0(%arg0: i32) -> (i32, i32, i32) {
    %c0_i32 = arith.constant 0 : i32
    %c0_i32_0 = arith.constant 0 : i32
    %c0_i32_1 = arith.constant 0 : i32
    return %arg0, %c0_i32, %c0_i32_0 : i32, i32, i32
  }
  func.func @transform_1(%arg0: i32) -> (i32, i32) {
    %c0_i32 = arith.constant 0 : i32
    %c0_i32_0 = arith.constant 0 : i32
    %c0_i32_1 = arith.constant 0 : i32
    return %c0_i32, %c0_i32_0 : i32, i32
  }
  func.func @transform_2(%arg0: i32) -> (i32, i32, i32) {
    %c0_i32 = arith.constant 0 : i32
    %c0_i32_0 = arith.constant 0 : i32
    %c0_i32_1 = arith.constant 0 : i32
    return %arg0, %c0_i32, %c0_i32_0 : i32, i32, i32
  }
  func.func @transform_3(%arg0: i32) -> (i32, i32) {
    %c0_i32 = arith.constant 0 : i32
    %c0_i32_0 = arith.constant 0 : i32
    %c0_i32_1 = arith.constant 0 : i32
    return %c0_i32, %c0_i32_0 : i32, i32
  }
  func.func @transform_4(%arg0: i32) -> (i32, i32) {
    %c0_i32 = arith.constant 0 : i32
    %c0_i32_0 = arith.constant 0 : i32
    %c0_i32_1 = arith.constant 0 : i32
    return %c0_i32, %c0_i32_0 : i32, i32
  }
  func.func @transform_5(%arg0: i32) -> (i32, i32, i32) {
    %c0_i32 = arith.constant 0 : i32
    %c0_i32_0 = arith.constant 0 : i32
    %c0_i32_1 = arith.constant 0 : i32
    return %arg0, %c0_i32, %c0_i32_0 : i32, i32, i32
  }
}

module attributes {stable_mosaic.version = 11 : i64} {
  func.func @_emb_ln_kernel(%arg0: i32, %arg1: memref<1x8x32xf32, #tpu.memory_space<vmem>>, %arg2: memref<8x32xf32, #tpu.memory_space<vmem>>, %arg3: memref<1x8x32xf32, #tpu.memory_space<vmem>>, %arg4: memref<1x32xf32, #tpu.memory_space<vmem>>, %arg5: memref<1x32xf32, #tpu.memory_space<vmem>>, %arg6: memref<1x8x32xbf16, #tpu.memory_space<vmem>>) attributes {dimension_semantics = [#tpu.dimension_semantics<parallel>], iteration_bounds = array<i64: 2>, scalar_prefetch = 0 : i64, scratch_operands = 0 : i64, tpu.core_type = #tpu.core_type<tc>, window_params = [{transform_indices = @transform_0, window_bounds = array<i64: 1, 8, 32>}, {pipeline_mode = #tpu.pipeline_mode<synchronous>, transform_indices = @transform_1, window_bounds = array<i64: 8, 32>}, {transform_indices = @transform_2, window_bounds = array<i64: 1, 8, 32>}, {pipeline_mode = #tpu.pipeline_mode<synchronous>, transform_indices = @transform_3, window_bounds = array<i64: 1, 32>}, {pipeline_mode = #tpu.pipeline_mode<synchronous>, transform_indices = @transform_4, window_bounds = array<i64: 1, 32>}, {transform_indices = @transform_5, window_bounds = array<i64: 1, 8, 32>}]} {
    %c0 = arith.constant 0 : index
    %c0_0 = arith.constant 0 : index
    %c0_1 = arith.constant 0 : index
    %0 = vector.load %arg1[%c0, %c0_0, %c0_1] : memref<1x8x32xf32, #tpu.memory_space<vmem>>, vector<1x8x32xf32>
    %1 = vector.shape_cast %0 : vector<1x8x32xf32> to vector<8x32xf32>
    %c0_2 = arith.constant 0 : index
    %c0_3 = arith.constant 0 : index
    %2 = vector.load %arg2[%c0_2, %c0_3] : memref<8x32xf32, #tpu.memory_space<vmem>>, vector<8x32xf32>
    %3 = arith.addf %1, %2 : vector<8x32xf32>
    %c0_4 = arith.constant 0 : index
    %c0_5 = arith.constant 0 : index
    %c0_6 = arith.constant 0 : index
    %4 = vector.load %arg3[%c0_4, %c0_5, %c0_6] : memref<1x8x32xf32, #tpu.memory_space<vmem>>, vector<1x8x32xf32>
    %5 = vector.shape_cast %4 : vector<1x8x32xf32> to vector<8x32xf32>
    %6 = arith.addf %3, %5 : vector<8x32xf32>
    %cst = arith.constant dense<0.000000e+00> : vector<8xf32>
    %7 = vector.multi_reduction <add>, %6, %cst [1] : vector<8x32xf32> to vector<8xf32>
    %8 = vector.shape_cast %7 : vector<8xf32> to vector<8x1xf32>
    %cst_7 = arith.constant 3.200000e+01 : f32
    %9 = vector.broadcast %cst_7 : f32 to vector<8x1xf32>
    %10 = arith.divf %8, %9 : vector<8x1xf32>
    %11 = vector.broadcast %10 : vector<8x1xf32> to vector<8x32xf32>
    %12 = arith.subf %6, %11 : vector<8x32xf32>
    %13 = arith.mulf %12, %12 : vector<8x32xf32>
    %cst_8 = arith.constant dense<0.000000e+00> : vector<8xf32>
    %14 = vector.multi_reduction <add>, %13, %cst_8 [1] : vector<8x32xf32> to vector<8xf32>
    %15 = vector.shape_cast %14 : vector<8xf32> to vector<8x1xf32>
    %cst_9 = arith.constant 3.200000e+01 : f32
    %16 = vector.broadcast %cst_9 : f32 to vector<8x1xf32>
    %17 = arith.divf %15, %16 : vector<8x1xf32>
    %18 = vector.broadcast %10 : vector<8x1xf32> to vector<8x32xf32>
    %19 = arith.subf %6, %18 : vector<8x32xf32>
    %cst_10 = arith.constant 9.99999996E-13 : f32
    %20 = vector.broadcast %cst_10 : f32 to vector<8x1xf32>
    %21 = arith.addf %17, %20 : vector<8x1xf32>
    %22 = math.rsqrt %21 : vector<8x1xf32>
    %23 = vector.broadcast %22 : vector<8x1xf32> to vector<8x32xf32>
    %24 = arith.mulf %19, %23 : vector<8x32xf32>
    %c0_11 = arith.constant 0 : index
    %c0_12 = arith.constant 0 : index
    %25 = vector.load %arg4[%c0_11, %c0_12] : memref<1x32xf32, #tpu.memory_space<vmem>>, vector<1x32xf32>
    %26 = vector.broadcast %25 : vector<1x32xf32> to vector<8x32xf32>
    %27 = arith.mulf %24, %26 : vector<8x32xf32>
    %c0_13 = arith.constant 0 : index
    %c0_14 = arith.constant 0 : index
    %28 = vector.load %arg5[%c0_13, %c0_14] : memref<1x32xf32, #tpu.memory_space<vmem>>, vector<1x32xf32>
    %29 = vector.broadcast %28 : vector<1x32xf32> to vector<8x32xf32>
    %30 = arith.addf %27, %29 : vector<8x32xf32>
    %31 = arith.truncf %30 : vector<8x32xf32> to vector<8x32xbf16>
    %c0_15 = arith.constant 0 : index
    %c0_16 = arith.constant 0 : index
    %c0_17 = arith.constant 0 : index
    %32 = vector.load %arg6[%c0_15, %c0_16, %c0_17] : memref<1x8x32xbf16, #tpu.memory_space<vmem>>, vector<1x8x32xbf16>
    %33 = vector.shape_cast %32 : vector<1x8x32xbf16> to vector<8x32xbf16>
    %34 = vector.shape_cast %31 : vector<8x32xbf16> to vector<1x8x32xbf16>
    tpu.vector_store %arg6[%c0_15, %c0_16, %c0_17], %34 {strides = array<i32>} : memref<1x8x32xbf16, #tpu.memory_space<vmem>>, vector<1x8x32xbf16>,
    return
  }
  func.func @transform_0(%arg0: i32) -> (i32, i32, i32) {
    %c0_i32 = arith.constant 0 : i32
    %c0_i32_0 = arith.constant 0 : i32
    %c0_i32_1 = arith.constant 0 : i32
    return %arg0, %c0_i32, %c0_i32_0 : i32, i32, i32
  }
  func.func @transform_1(%arg0: i32) -> (i32, i32) {
    %c0_i32 = arith.constant 0 : i32
    %c0_i32_0 = arith.constant 0 : i32
    %c0_i32_1 = arith.constant 0 : i32
    return %c0_i32, %c0_i32_0 : i32, i32
  }
  func.func @transform_2(%arg0: i32) -> (i32, i32, i32) {
    %c0_i32 = arith.constant 0 : i32
    %c0_i32_0 = arith.constant 0 : i32
    %c0_i32_1 = arith.constant 0 : i32
    return %arg0, %c0_i32, %c0_i32_0 : i32, i32, i32
  }
  func.func @transform_3(%arg0: i32) -> (i32, i32) {
    %c0_i32 = arith.constant 0 : i32
    %c0_i32_0 = arith.constant 0 : i32
    %c0_i32_1 = arith.constant 0 : i32
    return %c0_i32, %c0_i32_0 : i32, i32
  }
  func.func @transform_4(%arg0: i32) -> (i32, i32) {
    %c0_i32 = arith.constant 0 : i32
    %c0_i32_0 = arith.constant 0 : i32
    %c0_i32_1 = arith.constant 0 : i32
    return %c0_i32, %c0_i32_0 : i32, i32
  }
  func.func @transform_5(%arg0: i32) -> (i32, i32, i32) {
    %c0_i32 = arith.constant 0 : i32
    %c0_i32_0 = arith.constant 0 : i32
    %c0_i32_1 = arith.constant 0 : i32
    return %arg0, %c0_i32, %c0_i32_0 : i32, i32, i32
  }
}

</mosaic_0001>

<bundles_post_ra>
// kernel: tpu_custom_call.1
= control target key start
LH: loop header
LB: loop body
LE: loop exit
PB: predicated region body
PF: predicated region fallthrough
CT: control target
= control target key end

     0   :  { %10 = vsyncpa [#allocation3], 0  ;;  %s968_s0 = inlined_call_operand.hbm [shape: f32[2,8,32], index: 0, kind: input, shape index: {}]   ;;  %s969_s1 = inlined_call_operand.hbm [shape: f32[8,32], index: 1, kind: input, shape index: {}]   ;;  %s970_s2 = inlined_call_operand.hbm [shape: f32[2,8,32], index: 2, kind: input, shape index: {}]   ;;  %s971_s3 = inlined_call_operand.vmem [shape: f32[1,32], index: 3, kind: input, shape index: {}]   ;;  %s972_s4 = inlined_call_operand.vmem [shape: f32[1,32], index: 4, kind: input, shape index: {}]   ;;  %s973_s5 = inlined_call_operand.hbm [shape: bf16[2,8,32], index: 5, kind: output, shape index: {}]  }
   0x1   :  { %12 = vsyncpa [#allocation3 + $0x1], 0 }
   0x2   :  { %13 = vsyncpa [#allocation6], 0 }
   0x3   :  { %14 = vsyncpa [#allocation4], 0 }
   0x4   :  { %16 = vsyncpa [#allocation4 + $0x1], 0  ;;  %s721_s18 = smov 0   ;;  %s723_s19 = smov 0  }
   0x5   :  { %s725_s20 = smov 0   ;;  %s727_s21 = smov 0  }
   0x6 LB: > { %s742_s22 = sadd.s32 1, %s685_s21   ;;  %s29_s23 = sadd.s32 1, %s681_s20  ;;  %s685_s21 = sphi %s727_s21, %s998_s21   ;;  %s681_s20 = sphi %s725_s20, %s997_s20   ;;  %s677_s19 = sphi %s723_s19, %s996_s19   ;;  %s673_s18 = sphi %s721_s18, %s995_s18  }
   0x7   : > { %s26_s24 = ssub.s32 %s685_s21, %s742_s22  ;;  %p36_p0 = scmp.ne.s32.totalorder %s681_s20, %s677_s19 }
   0x8   : > { %p27_p1 = scmp.eq.s32.totalorder %s26_s24, 0  ;;  %p37_p2 = scmp.eq.s32.totalorder %s685_s21, 0 }
   0x9   : > { %p485_p4 = scmp.lt.s32.totalorder %s685_s21, 2  ;;  %s198_s26 = sand.u32 1, %s685_s21  }
   0xa   : > { %s753_s25 = scalar_select %p27_p1, %s681_s20, %s29_s23  }
   0xb   : > { %p38_p5 = por %p37_p2, %p36_p0  ;;  %s200_s27 = sand.u32 1, %s681_s20  }
   0xc   : > { %s760_s28 = sshll.u32 %s200_s27, 3  ;;  %s445_s29 = sshll.u32 %s685_s21, 7 }
   0xd   : > { %s768_s7 = scalar_lea.hbm %s968_s0, %s445_s29  ;;  %s202_s8 = scalar_lea.vmem [#allocation2], %s760_s28 }
   0xe   : > { %s209_s9 = sshll.u32 %s202_s8, 4  ;;  %p771_p6 = pnand %p485_p4, %p38_p5  ;;  %s775_s9 = int_to_ptr.vmem [resolvable:$true] %s209_s9 }
   0xf   : > { %s777_s11 = scalar_lea.sflag [#allocation3], %s198_s26  ;;  %s523_s12 = scalar_lea.hbm %s768_s7, 128 }
  0x10   : > { %p524_p7 = scmp.ne.s32.totalorder %s768_s7, %s523_s12  ;;  %p525_p8 = pneg %p771_p6 }
  0x11   : > { %s528_s15 = scalar_lea.hbm %s968_s0, 256  ;;  %p529_p11 = scmp.lt.u32.totalorder %s768_s7, %s968_s0 }
  0x12   : > { %p526_p9 = pnand %p525_p8, %p524_p7  ;;  %p530_p12 = scmp.lt.u32.totalorder %s528_s15, %s523_s12 }
  0x13   : > { %p532_p1 = scmp.lt.u32.totalorder %s523_s12, %s768_s7 }
  0x14   : > { %p527_p10 = pneg %p526_p9  ;;  %p531_p13 = por %p530_p12, %p529_p11 }
  0x16   : > { %p533_p2 = por %p532_p1, %p531_p13 }
  0x18   : > { %p534_p4 = pnand %p533_p2, %p527_p10 }
  0x1a   : > { %537 = shalt.err (!%p534_p4)
}
  0x1b   : > { %s538_s23 = scalar_lea.vmem %s775_s9, 128  ;;  %s687_s24 = smov [#allocation2]  }
  0x1c   : > { %p539_p5 = scmp.ne.s32.totalorder %s775_s9, %s538_s23  ;;  %s543_s26 = sshll.u32 %s687_s24, 4  ;;  %s544_s26 = int_to_ptr.vmem [resolvable:$false] %s543_s26 }
  0x1d   : > { %s545_s27 = scalar_lea.vmem %s544_s26, 256  ;;  %p546_p3 = scmp.lt.s32.totalorder %s775_s9, %s544_s26 }
  0x1e   : > { %p541_p7 = pnand %p539_p5, %p525_p8  ;;  %p547_p11 = scmp.lt.s32.totalorder %s545_s27, %s538_s23 }
  0x20   : > { %p542_p9 = pneg %p541_p7  ;;  %p548_p12 = por %p547_p11, %p546_p3 }
  0x22   : > { %p549_p13 = pnand %p548_p12, %p542_p9 }
  0x24   : > { %552 = shalt.err (!%p549_p13)
}
  0x25   : > { %476 = dma.hbm_to_vmem [thread:$0]  (!%p771_p6), %s768_s7, 128, %s775_s9, %s777_s11  }
  0x26   : > { %s806_s30 = sadd.s32 4294967295, %s685_s21   ;;  %s440_s6 = sadd.s32 4294967294, %s685_s21  }
  0x27   : > { %p42_p3 = scmp.ne.s32.totalorder %s677_s19, %s673_s18  ;;  %p974_p10 = scmp.eq.s32.totalorder %s806_s30, 0 }
  0x28   : > { %p155_p1 = scmp.eq.s32.totalorder %s806_s30, 1  ;;  %p161_p2 = scmp.eq.s32.totalorder %s440_s6, 1 }
  0x29   : > { %p815_p4 = por %p974_p10, %p42_p3  ;;  %p441_p5 = scmp.ge.s32.totalorder %s685_s21, 1 }
  0x2a   : > { %p823_p7 = por %p155_p1, %p36_p0  ;;  %p827_p9 = por %p161_p2, %p42_p3 }
  0x2b   : > { %s980_s8 = scalar_select %p815_p4, 1, 0 }
  0x2c   : > { %s981_s7 = scalar_select %p823_p7, 1, 0 }
  0x2d   : > { %s982_s9 = scalar_select %p827_p9, 1, 0 }
  0x2e   : > { %p168_p11 = scmp.lt.s32.totalorder %s685_s21, 3  ;;  %s220_s12 = scalar_lea.vmem [#allocation7], %s760_s28 }
  0x2f   : > { %s227_s13 = sshll.u32 %s220_s12, 4  ;;  %s838_s16 = scalar_lea.hbm %s970_s2, %s445_s29  ;;  %s228_s13 = int_to_ptr.vmem [resolvable:$true] %s227_s13 }
  0x30   : > { %p840_p0 = pnand %p441_p5, %p168_p11  ;;  %s688_s23 = smov [#allocation5]  }
  0x31   : > { %s844_s24 = sshll.u32 %s688_s23, 4  ;;  %s553_s28 = scalar_lea.hbm %s838_s16, 128  ;;  %s182_s24 = int_to_ptr.vmem [resolvable:$true] %s844_s24 }
  0x32   : > { %s983_s17 = scalar_select %p840_p0, 1, 0 }
  0x33   : > { %p554_p13 = scmp.ne.s32.totalorder %s838_s16, %s553_s28  ;;  %s558_s27 = scalar_lea.hbm %s970_s2, 256 }
  0x34   : > { %p559_p2 = scmp.lt.u32.totalorder %s838_s16, %s970_s2  ;;  %p560_p5 = scmp.lt.u32.totalorder %s558_s27, %s553_s28 }
  0x35   : > { %p556_p3 = pnand %p554_p13, %p525_p8  ;;  %p562_p10 = scmp.lt.u32.totalorder %s553_s28, %s838_s16 }
  0x36   : > { %p561_p11 = por %p560_p5, %p559_p2 }
  0x37   : > { %p557_p1 = pneg %p556_p3 }
  0x38   : > { %p563_p9 = por %p562_p10, %p561_p11 }
  0x3a   : > { %p564_p7 = pnand %p563_p9, %p557_p1 }
  0x3c   : > { %567 = shalt.err (!%p564_p7)
}
  0x3d   : > { %s568_s14 = scalar_lea.vmem %s228_s13, 128  ;;  %s689_s15 = smov [#allocation7]  }
  0x3e   : > { %p569_p12 = scmp.ne.s32.totalorder %s228_s13, %s568_s14  ;;  %s573_s23 = sshll.u32 %s689_s15, 4  ;;  %s574_s23 = int_to_ptr.vmem [resolvable:$false] %s573_s23 }
  0x3f   : > { %s575_s29 = scalar_lea.vmem %s574_s23, 256  ;;  %p576_p4 = scmp.lt.s32.totalorder %s228_s13, %s574_s23 }
  0x40   : > { %p571_p13 = pnand %p569_p12, %p525_p8  ;;  %p577_p0 = scmp.lt.s32.totalorder %s575_s29, %s568_s14 }
  0x42   : > { %p572_p3 = pneg %p571_p13  ;;  %p578_p2 = por %p577_p0, %p576_p4 }
  0x44   : > { %p579_p5 = pnand %p578_p2, %p572_p3 }
  0x46   : > { %582 = shalt.err (!%p579_p5)
}
  0x47   : > { %479 = dma.hbm_to_vmem [thread:$0]  (!%p771_p6), %s838_s16, 128, %s228_s13, %s777_s11  }
  0x48   : > { %p984_p8 = scmp.eq.s32.totalorder %s806_s30, 0  ;;  %p985_p10 = scmp.ne.s32.totalorder %s983_s17, 0 }
  0x49   : > { %s583_s6 = scalar_lea.hbm %s969_s1, 128 }
  0x4a   : > { %p986_p7 = pneg %p985_p10  ;;  %p584_p4 = scmp.ne.s32.totalorder %s969_s1, %s583_s6 }
  0x4b   : > { %p590_p1 = scmp.lt.u32.totalorder %s583_s6, %s969_s1 }
  0x4c   : > { %p874_p9 = pnand %p986_p7, %p984_p8 }
  0x4e   : > { %p585_p0 = pneg %p874_p9 }
  0x50   : > { %p586_p6 = pnand %p585_p0, %p584_p4 }
  0x52   : > { %p587_p12 = pneg %p586_p6 }
  0x54   : > { %p592_p11 = pnand %p590_p1, %p587_p12 }
  0x56   : > { %595 = shalt.err (!%p592_p11)
}
  0x57   : > { %s596_s16 = scalar_lea.vmem %s182_s24, 128  ;;  %p604_p5 = scmp.lt.s32.totalorder %s182_s24, %s182_s24 }
  0x58   : > { %p597_p13 = scmp.ne.s32.totalorder %s182_s24, %s596_s16  ;;  %p605_p8 = scmp.lt.s32.totalorder %s596_s16, %s596_s16 }
  0x5a   : > { %p599_p3 = pnand %p597_p13, %p585_p0  ;;  %p606_p7 = por %p605_p8, %p604_p5 }
  0x5c   : > { %p600_p2 = pneg %p599_p3 }
  0x5e   : > { %p607_p10 = pnand %p606_p7, %p600_p2 }
  0x60   : > { %610 = shalt.err (!%p607_p10)
}
  0x61   : > { %472 = dma.hbm_to_vmem [thread:$0]  (!%p874_p9), %s969_s1, 128, %s182_s24, [#allocation6]  }
  0x62   : > { %p988_p4 = scmp.ne.s32.totalorder %s983_s17, 0 }
  0x63   : > { %s238_s23 = sand.u32 (!%p988_p4), 1, %s806_s30   ;;  %s898_s29 = sand.u32 (!%p988_p4), 1, %s677_s19  }
  0x64   : > { %236 = sbr.rel (%p988_p4) target bundleno = 448 (0x1c0), region = 40  ;;  %s449_s26 = sshll.u32 (!%p988_p4), %s898_s29, 3 }
  0x65   : > { %s239_s27 = scalar_lea.sflag (!%p988_p4), [#allocation3], %s238_s23  ;;  %s242_s6 = scalar_lea.vmem (!%p988_p4), [#allocation2], %s449_s26 }
  0x66   : > { %p989_p10 = scmp.ne.s32.totalorder (!%p988_p4), %s980_s8, 0 }
  0x6b   : > { %656 = dma.done.wait (%p989_p10), %s239_s27, 128  }
  0x6c   : > { %658 = vsyncadd (%p989_p10), %s239_s27, 4294967168  ;;  %p990_p9 = scmp.eq.s32.totalorder %s806_s30, 0 }
  0x6e   : > { %660 = dma.done.wait (%p990_p9), [#allocation6], 128   ;;  %p991_p0 = pmov %p990_p9 }
  0x6f   : > { %s255_s17 = scalar_lea.vmem [#allocation7], %s449_s26 }
  0x70   : > { %662 = vsyncadd (%p991_p0), [#allocation6], 4294967168 }
  0x71   : > { %664 = dma.done.wait (%p989_p10), %s239_s27, 128  }
  0x72   : > { %666 = vsyncadd (%p989_p10), %s239_s27, 4294967168  ;;  %v287_v0 = vld [vmem:[%s242_s6] sm:$0xff]  ;;  %v288_v1 = vld [vmem:[#allocation5] sm:$0xff]  ;;  %vm292_vm0 = vcmask 261120   ;;  %s452_s8 = sshll.u32 %s898_s29, 2  ;;  %s456_s11 = sshll.u32 %s806_s30, 6 }
  0x73   : > { %v290_v2 = vld [vmem:[%s255_s17] sm:$0xff]  ;;  %v289_v3 = vadd.f32 %v288_v1, %v287_v0  ;;  %s286_s13 = scalar_lea.vmem [#allocation8], %s452_s8  ;;  %vm324_vm1 = vcmask 257024   ;;  %s924_s23 = scalar_lea.hbm %s973_s5, %s456_s11 }
  0x74   : > { %v453_v15 = vld [vmem:[%s971_s3] ss:$0 sm:$0xff]  ;;  %s340_s16 = sshll.u32 %s286_s13, 4  ;;  %s327_s26 = scalar_lea.sflag [#allocation4], %s898_s29  ;;  %s926_s16 = int_to_ptr.vmem [resolvable:$true] %s340_s16 }
  0x75   : > { %v291_v4 = vadd.f32 %v290_v2, %v289_v3  ;;  %v454_v17 = vld [vmem:[%s972_s4] ss:$0 sm:$0xff]  ;;  %s611_s27 = scalar_lea.vmem %s926_s16, 64  ;;  %p992_p12 = scmp.ne.s32.totalorder %s981_s7, 0 }
  0x76   : > { %p612_p6 = scmp.ne.s32.totalorder %s926_s16, %s611_s27  ;;  %s690_s30 = smov [#allocation8]  }
  0x77   : > { %v293_v5 = vsel %vm292_vm0, %v291_v4, 0.0  ;;  %s615_s6 = sshll.u32 %s690_s30, 4  ;;  %s616_s6 = int_to_ptr.vmem [resolvable:$false] %s615_s6 }
  0x78   : > { %294 = vadd.xlane.f32.xlu0 %v293_v5  ;;  %p613_p1 = pnand %p612_p6, %p992_p12  ;;  %s617_s17 = scalar_lea.vmem %s616_s6, 128 }
  0x79   : > { %p618_p13 = scmp.lt.s32.totalorder %s926_s16, %s616_s6  ;;  %p619_p3 = scmp.lt.s32.totalorder %s617_s17, %s611_s27 }
  0x7a   : > { %p614_p11 = pneg %p613_p1 }
  0x7b   : > { %p620_p2 = por %p619_p3, %p618_p13 }
  0x7d   : > { %p621_p5 = pnand %p620_p2, %p614_p11 }
 0x105   : > { %v295_v6 = vpop.xlane.xlu0 %294 }
 0x106   : > { %v297_v7 = vmul.f32 0.03125, %v295_v6 }
 0x108   : > { %v298_v8 = vsub.f32 %v291_v4, %v297_v7 }
 0x10a   : > { %v299_v9 = vmul.f32 %v298_v8, %v298_v8 }
 0x10c   : > { %v300_v10 = vsel %vm292_vm0, %v299_v9, 0.0 }
 0x10d   : > { %301 = vadd.xlane.f32.xlu0 %v300_v10 }
 0x19a   : > { %v302_v11 = vpop.xlane.xlu0 %301 }
 0x19b   : > { %v303_v12 = vmul.f32 0.03125, %v302_v11 }
 0x19d   : > { %v304_v13 = vadd.f32 1e-12, %v303_v12 }
 0x19f   : > { %521 = vrsqrt.f32 %v304_v13 }
 0x1a9   : > { %v522_v14 = vpop.eup %521 }
 0x1aa   : > { %v306_v16 = vmul.f32 %v522_v14, %v298_v8 }
 0x1ac   : > { %v314_v18 = vmul.f32 %v453_v15, %v306_v16 }
 0x1ae   : > { %v322_v19 = vadd.f32 %v454_v17, %v314_v18 }
 0x1b0   : > { %v323_v20 = vpack.c.bf16 %v322_v19, %v322_v19 }
 0x1b2   : > { %325 = vst.msk [vmem:[%s286_s13] sm:$0xf] %vm324_vm1, %v323_v20 }
 0x1b3   : > { %624 = shalt.err (!%p621_p5)
}
 0x1b4   : > { %s625_s29 = scalar_lea.hbm %s924_s23, 64  ;;  %s629_s28 = scalar_lea.hbm %s973_s5, 128 }
 0x1b5   : > { %p626_p8 = scmp.ne.s32.totalorder %s924_s23, %s625_s29  ;;  %p630_p10 = scmp.lt.u32.totalorder %s924_s23, %s973_s5 }
 0x1b6   : > { %p631_p9 = scmp.lt.u32.totalorder %s629_s28, %s625_s29  ;;  %p633_p6 = scmp.lt.u32.totalorder %s625_s29, %s924_s23 }
 0x1b7   : > { %p627_p7 = pnand %p626_p8, %p992_p12 }
 0x1b8   : > { %p632_p0 = por %p631_p9, %p630_p10 }
 0x1b9   : > { %p628_p4 = pneg %p627_p7 }
 0x1ba   : > { %p634_p1 = por %p633_p6, %p632_p0 }
 0x1bc   : > { %p635_p11 = pnand %p634_p1, %p628_p4 }
 0x1be   : > { %638 = shalt.err (!%p635_p11)
}
 0x1bf   : > { %467 = dma.vmem_to_hbm [thread:$0]  (%p992_p12), %s926_s16, 64, %s924_s23, %s327_s26  }
 0x1c0 PF: > { %s352_s11 = sand.u32 1, %s673_s18   ;;  %p993_p13 = scmp.ne.s32.totalorder %s982_s9, 0 }
 0x1c1   : > { %p994_p3 = scmp.ge.s32.totalorder %s685_s21, 2  ;;  %s353_s13 = scalar_lea.sflag [#allocation4], %s352_s11 }
 0x1c3   : > { %p481_p2 = pnand %p994_p3, %p993_p13 }
 0x1c5   : > { %668 = dma.done.wait (!%p481_p2), %s353_s13, 64  }
 0x1c6   : > { %670 = vsyncadd (!%p481_p2), %s353_s13, 4294967232  ;;  %p19_p5 = scmp.ge.s32.totalorder %s742_s22, 4   ;;  %s995_s18 = smov %s677_s19 }
 0x1c7   : > { %s996_s19 = smov %s681_s20  ;;  %s997_s20 = smov %s753_s25 }
 0x1c8   : > { %s998_s21 = smov %s742_s22  ;;  %21 = sbr.rel (!%p19_p5) target bundleno = 6 (0x6), region = 100 }
 0x1cf   :  { %358 = vsyncpa [#allocation3], 1 }
 0x1d0   :  { %360 = vsyncpa [#allocation3 + $0x1], 1 }
 0x1d1   :  { %361 = vsyncpa [#allocation6], 1 }
 0x1d2   :  { %362 = vsyncpa [#allocation4], 1 }
 0x1d3   :  { %364 = vsyncpa [#allocation4 + $0x1], 1 }

// kernel: tpu_custom_call.1
= control target key start
LH: loop header
LB: loop body
LE: loop exit
PB: predicated region body
PF: predicated region fallthrough
CT: control target
= control target key end

     0   :  { %10 = vsyncpa [#allocation3], 0  ;;  %s968_s0 = inlined_call_operand.hbm [shape: f32[2,8,32], index: 0, kind: input, shape index: {}]   ;;  %s969_s1 = inlined_call_operand.hbm [shape: f32[8,32], index: 1, kind: input, shape index: {}]   ;;  %s970_s2 = inlined_call_operand.hbm [shape: f32[2,8,32], index: 2, kind: input, shape index: {}]   ;;  %s971_s3 = inlined_call_operand.vmem [shape: f32[1,32], index: 3, kind: input, shape index: {}]   ;;  %s972_s4 = inlined_call_operand.vmem [shape: f32[1,32], index: 4, kind: input, shape index: {}]   ;;  %s973_s5 = inlined_call_operand.hbm [shape: bf16[2,8,32], index: 5, kind: output, shape index: {}]  }
   0x1   :  { %12 = vsyncpa [#allocation3 + $0x1], 0 }
   0x2   :  { %13 = vsyncpa [#allocation6], 0 }
   0x3   :  { %14 = vsyncpa [#allocation4], 0 }
   0x4   :  { %16 = vsyncpa [#allocation4 + $0x1], 0  ;;  %s721_s18 = smov 0   ;;  %s723_s19 = smov 0  }
   0x5   :  { %s725_s20 = smov 0   ;;  %s727_s21 = smov 0  }
   0x6 LB: > { %s742_s22 = sadd.s32 1, %s685_s21   ;;  %s29_s23 = sadd.s32 1, %s681_s20  ;;  %s685_s21 = sphi %s727_s21, %s998_s21   ;;  %s681_s20 = sphi %s725_s20, %s997_s20   ;;  %s677_s19 = sphi %s723_s19, %s996_s19   ;;  %s673_s18 = sphi %s721_s18, %s995_s18  }
   0x7   : > { %s26_s24 = ssub.s32 %s685_s21, %s742_s22  ;;  %p36_p0 = scmp.ne.s32.totalorder %s681_s20, %s677_s19 }
   0x8   : > { %p27_p1 = scmp.eq.s32.totalorder %s26_s24, 0  ;;  %p37_p2 = scmp.eq.s32.totalorder %s685_s21, 0 }
   0x9   : > { %p485_p4 = scmp.lt.s32.totalorder %s685_s21, 2  ;;  %s198_s26 = sand.u32 1, %s685_s21  }
   0xa   : > { %s753_s25 = scalar_select %p27_p1, %s681_s20, %s29_s23  }
   0xb   : > { %p38_p5 = por %p37_p2, %p36_p0  ;;  %s200_s27 = sand.u32 1, %s681_s20  }
   0xc   : > { %s760_s28 = sshll.u32 %s200_s27, 3  ;;  %s445_s29 = sshll.u32 %s685_s21, 7 }
   0xd   : > { %s768_s7 = scalar_lea.hbm %s968_s0, %s445_s29  ;;  %s202_s8 = scalar_lea.vmem [#allocation2], %s760_s28 }
   0xe   : > { %s209_s9 = sshll.u32 %s202_s8, 4  ;;  %p771_p6 = pnand %p485_p4, %p38_p5  ;;  %s775_s9 = int_to_ptr.vmem [resolvable:$true] %s209_s9 }
   0xf   : > { %s777_s11 = scalar_lea.sflag [#allocation3], %s198_s26  ;;  %s523_s12 = scalar_lea.hbm %s768_s7, 128 }
  0x10   : > { %p524_p7 = scmp.ne.s32.totalorder %s768_s7, %s523_s12  ;;  %p525_p8 = pneg %p771_p6 }
  0x11   : > { %s528_s15 = scalar_lea.hbm %s968_s0, 256  ;;  %p529_p11 = scmp.lt.u32.totalorder %s768_s7, %s968_s0 }
  0x12   : > { %p526_p9 = pnand %p525_p8, %p524_p7  ;;  %p530_p12 = scmp.lt.u32.totalorder %s528_s15, %s523_s12 }
  0x13   : > { %p532_p1 = scmp.lt.u32.totalorder %s523_s12, %s768_s7 }
  0x14   : > { %p527_p10 = pneg %p526_p9  ;;  %p531_p13 = por %p530_p12, %p529_p11 }
  0x16   : > { %p533_p2 = por %p532_p1, %p531_p13 }
  0x18   : > { %p534_p4 = pnand %p533_p2, %p527_p10 }
  0x1a   : > { %537 = shalt.err (!%p534_p4)
}
  0x1b   : > { %s538_s23 = scalar_lea.vmem %s775_s9, 128  ;;  %s687_s24 = smov [#allocation2]  }
  0x1c   : > { %p539_p5 = scmp.ne.s32.totalorder %s775_s9, %s538_s23  ;;  %s543_s26 = sshll.u32 %s687_s24, 4  ;;  %s544_s26 = int_to_ptr.vmem [resolvable:$false] %s543_s26 }
  0x1d   : > { %s545_s27 = scalar_lea.vmem %s544_s26, 256  ;;  %p546_p3 = scmp.lt.s32.totalorder %s775_s9, %s544_s26 }
  0x1e   : > { %p541_p7 = pnand %p539_p5, %p525_p8  ;;  %p547_p11 = scmp.lt.s32.totalorder %s545_s27, %s538_s23 }
  0x20   : > { %p542_p9 = pneg %p541_p7  ;;  %p548_p12 = por %p547_p11, %p546_p3 }
  0x22   : > { %p549_p13 = pnand %p548_p12, %p542_p9 }
  0x24   : > { %552 = shalt.err (!%p549_p13)
}
  0x25   : > { %476 = dma.hbm_to_vmem [thread:$0]  (!%p771_p6), %s768_s7, 128, %s775_s9, %s777_s11  }
  0x26   : > { %s806_s30 = sadd.s32 4294967295, %s685_s21   ;;  %s440_s6 = sadd.s32 4294967294, %s685_s21  }
  0x27   : > { %p42_p3 = scmp.ne.s32.totalorder %s677_s19, %s673_s18  ;;  %p974_p10 = scmp.eq.s32.totalorder %s806_s30, 0 }
  0x28   : > { %p155_p1 = scmp.eq.s32.totalorder %s806_s30, 1  ;;  %p161_p2 = scmp.eq.s32.totalorder %s440_s6, 1 }
  0x29   : > { %p815_p4 = por %p974_p10, %p42_p3  ;;  %p441_p5 = scmp.ge.s32.totalorder %s685_s21, 1 }
  0x2a   : > { %p823_p7 = por %p155_p1, %p36_p0  ;;  %p827_p9 = por %p161_p2, %p42_p3 }
  0x2b   : > { %s980_s8 = scalar_select %p815_p4, 1, 0 }
  0x2c   : > { %s981_s7 = scalar_select %p823_p7, 1, 0 }
  0x2d   : > { %s982_s9 = scalar_select %p827_p9, 1, 0 }
  0x2e   : > { %p168_p11 = scmp.lt.s32.totalorder %s685_s21, 3  ;;  %s220_s12 = scalar_lea.vmem [#allocation7], %s760_s28 }
  0x2f   : > { %s227_s13 = sshll.u32 %s220_s12, 4  ;;  %s838_s16 = scalar_lea.hbm %s970_s2, %s445_s29  ;;  %s228_s13 = int_to_ptr.vmem [resolvable:$true] %s227_s13 }
  0x30   : > { %p840_p0 = pnand %p441_p5, %p168_p11  ;;  %s688_s23 = smov [#allocation5]  }
  0x31   : > { %s844_s24 = sshll.u32 %s688_s23, 4  ;;  %s553_s28 = scalar_lea.hbm %s838_s16, 128  ;;  %s182_s24 = int_to_ptr.vmem [resolvable:$true] %s844_s24 }
  0x32   : > { %s983_s17 = scalar_select %p840_p0, 1, 0 }
  0x33   : > { %p554_p13 = scmp.ne.s32.totalorder %s838_s16, %s553_s28  ;;  %s558_s27 = scalar_lea.hbm %s970_s2, 256 }
  0x34   : > { %p559_p2 = scmp.lt.u32.totalorder %s838_s16, %s970_s2  ;;  %p560_p5 = scmp.lt.u32.totalorder %s558_s27, %s553_s28 }
  0x35   : > { %p556_p3 = pnand %p554_p13, %p525_p8  ;;  %p562_p10 = scmp.lt.u32.totalorder %s553_s28, %s838_s16 }
  0x36   : > { %p561_p11 = por %p560_p5, %p559_p2 }
  0x37   : > { %p557_p1 = pneg %p556_p3 }
  0x38   : > { %p563_p9 = por %p562_p10, %p561_p11 }
  0x3a   : > { %p564_p7 = pnand %p563_p9, %p557_p1 }
  0x3c   : > { %567 = shalt.err (!%p564_p7)
}
  0x3d   : > { %s568_s14 = scalar_lea.vmem %s228_s13, 128  ;;  %s689_s15 = smov [#allocation7]  }
  0x3e   : > { %p569_p12 = scmp.ne.s32.totalorder %s228_s13, %s568_s14  ;;  %s573_s23 = sshll.u32 %s689_s15, 4  ;;  %s574_s23 = int_to_ptr.vmem [resolvable:$false] %s573_s23 }
  0x3f   : > { %s575_s29 = scalar_lea.vmem %s574_s23, 256  ;;  %p576_p4 = scmp.lt.s32.totalorder %s228_s13, %s574_s23 }
  0x40   : > { %p571_p13 = pnand %p569_p12, %p525_p8  ;;  %p577_p0 = scmp.lt.s32.totalorder %s575_s29, %s568_s14 }
  0x42   : > { %p572_p3 = pneg %p571_p13  ;;  %p578_p2 = por %p577_p0, %p576_p4 }
  0x44   : > { %p579_p5 = pnand %p578_p2, %p572_p3 }
  0x46   : > { %582 = shalt.err (!%p579_p5)
}
  0x47   : > { %479 = dma.hbm_to_vmem [thread:$0]  (!%p771_p6), %s838_s16, 128, %s228_s13, %s777_s11  }
  0x48   : > { %p984_p8 = scmp.eq.s32.totalorder %s806_s30, 0  ;;  %p985_p10 = scmp.ne.s32.totalorder %s983_s17, 0 }
  0x49   : > { %s583_s6 = scalar_lea.hbm %s969_s1, 128 }
  0x4a   : > { %p986_p7 = pneg %p985_p10  ;;  %p584_p4 = scmp.ne.s32.totalorder %s969_s1, %s583_s6 }
  0x4b   : > { %p590_p1 = scmp.lt.u32.totalorder %s583_s6, %s969_s1 }
  0x4c   : > { %p874_p9 = pnand %p986_p7, %p984_p8 }
  0x4e   : > { %p585_p0 = pneg %p874_p9 }
  0x50   : > { %p586_p6 = pnand %p585_p0, %p584_p4 }
  0x52   : > { %p587_p12 = pneg %p586_p6 }
  0x54   : > { %p592_p11 = pnand %p590_p1, %p587_p12 }
  0x56   : > { %595 = shalt.err (!%p592_p11)
}
  0x57   : > { %s596_s16 = scalar_lea.vmem %s182_s24, 128  ;;  %p604_p5 = scmp.lt.s32.totalorder %s182_s24, %s182_s24 }
  0x58   : > { %p597_p13 = scmp.ne.s32.totalorder %s182_s24, %s596_s16  ;;  %p605_p8 = scmp.lt.s32.totalorder %s596_s16, %s596_s16 }
  0x5a   : > { %p599_p3 = pnand %p597_p13, %p585_p0  ;;  %p606_p7 = por %p605_p8, %p604_p5 }
  0x5c   : > { %p600_p2 = pneg %p599_p3 }
  0x5e   : > { %p607_p10 = pnand %p606_p7, %p600_p2 }
  0x60   : > { %610 = shalt.err (!%p607_p10)
}
  0x61   : > { %472 = dma.hbm_to_vmem [thread:$0]  (!%p874_p9), %s969_s1, 128, %s182_s24, [#allocation6]  }
  0x62   : > { %p988_p4 = scmp.ne.s32.totalorder %s983_s17, 0 }
  0x63   : > { %s238_s23 = sand.u32 (!%p988_p4), 1, %s806_s30   ;;  %s898_s29 = sand.u32 (!%p988_p4), 1, %s677_s19  }
  0x64   : > { %236 = sbr.rel (%p988_p4) target bundleno = 448 (0x1c0), region = 40  ;;  %s449_s26 = sshll.u32 (!%p988_p4), %s898_s29, 3 }
  0x65   : > { %s239_s27 = scalar_lea.sflag (!%p988_p4), [#allocation3], %s238_s23  ;;  %s242_s6 = scalar_lea.vmem (!%p988_p4), [#allocation2], %s449_s26 }
  0x66   : > { %p989_p10 = scmp.ne.s32.totalorder (!%p988_p4), %s980_s8, 0 }
  0x6b   : > { %656 = dma.done.wait (%p989_p10), %s239_s27, 128  }
  0x6c   : > { %658 = vsyncadd (%p989_p10), %s239_s27, 4294967168  ;;  %p990_p9 = scmp.eq.s32.totalorder %s806_s30, 0 }
  0x6e   : > { %660 = dma.done.wait (%p990_p9), [#allocation6], 128   ;;  %p991_p0 = pmov %p990_p9 }
  0x6f   : > { %s255_s17 = scalar_lea.vmem [#allocation7], %s449_s26 }
  0x70   : > { %662 = vsyncadd (%p991_p0), [#allocation6], 4294967168 }
  0x71   : > { %664 = dma.done.wait (%p989_p10), %s239_s27, 128  }
  0x72   : > { %666 = vsyncadd (%p989_p10), %s239_s27, 4294967168  ;;  %v287_v0 = vld [vmem:[%s242_s6] sm:$0xff]  ;;  %v288_v1 = vld [vmem:[#allocation5] sm:$0xff]  ;;  %vm292_vm0 = vcmask 261120   ;;  %s452_s8 = sshll.u32 %s898_s29, 2  ;;  %s456_s11 = sshll.u32 %s806_s30, 6 }
  0x73   : > { %v290_v2 = vld [vmem:[%s255_s17] sm:$0xff]  ;;  %v289_v3 = vadd.f32 %v288_v1, %v287_v0  ;;  %s286_s13 = scalar_lea.vmem [#allocation8], %s452_s8  ;;  %vm324_vm1 = vcmask 257024   ;;  %s924_s23 = scalar_lea.hbm %s973_s5, %s456_s11 }
  0x74   : > { %v453_v15 = vld [vmem:[%s971_s3] ss:$0 sm:$0xff]  ;;  %s340_s16 = sshll.u32 %s286_s13, 4  ;;  %s327_s26 = scalar_lea.sflag [#allocation4], %s898_s29  ;;  %s926_s16 = int_to_ptr.vmem [resolvable:$true] %s340_s16 }
  0x75   : > { %v291_v4 = vadd.f32 %v290_v2, %v289_v3  ;;  %v454_v17 = vld [vmem:[%s972_s4] ss:$0 sm:$0xff]  ;;  %s611_s27 = scalar_lea.vmem %s926_s16, 64  ;;  %p992_p12 = scmp.ne.s32.totalorder %s981_s7, 0 }
  0x76   : > { %p612_p6 = scmp.ne.s32.totalorder %s926_s16, %s611_s27  ;;  %s690_s30 = smov [#allocation8]  }
  0x77   : > { %v293_v5 = vsel %vm292_vm0, %v291_v4, 0.0  ;;  %s615_s6 = sshll.u32 %s690_s30, 4  ;;  %s616_s6 = int_to_ptr.vmem [resolvable:$false] %s615_s6 }
  0x78   : > { %294 = vadd.xlane.f32.xlu0 %v293_v5  ;;  %p613_p1 = pnand %p612_p6, %p992_p12  ;;  %s617_s17 = scalar_lea.vmem %s616_s6, 128 }
  0x79   : > { %p618_p13 = scmp.lt.s32.totalorder %s926_s16, %s616_s6  ;;  %p619_p3 = scmp.lt.s32.totalorder %s617_s17, %s611_s27 }
  0x7a   : > { %p614_p11 = pneg %p613_p1 }
  0x7b   : > { %p620_p2 = por %p619_p3, %p618_p13 }
  0x7d   : > { %p621_p5 = pnand %p620_p2, %p614_p11 }
 0x105   : > { %v295_v6 = vpop.xlane.xlu0 %294 }
 0x106   : > { %v297_v7 = vmul.f32 0.03125, %v295_v6 }
 0x108   : > { %v298_v8 = vsub.f32 %v291_v4, %v297_v7 }
 0x10a   : > { %v299_v9 = vmul.f32 %v298_v8, %v298_v8 }
 0x10c   : > { %v300_v10 = vsel %vm292_vm0, %v299_v9, 0.0 }
 0x10d   : > { %301 = vadd.xlane.f32.xlu0 %v300_v10 }
 0x19a   : > { %v302_v11 = vpop.xlane.xlu0 %301 }
 0x19b   : > { %v303_v12 = vmul.f32 0.03125, %v302_v11 }
 0x19d   : > { %v304_v13 = vadd.f32 1e-12, %v303_v12 }
 0x19f   : > { %521 = vrsqrt.f32 %v304_v13 }
 0x1a9   : > { %v522_v14 = vpop.eup %521 }
 0x1aa   : > { %v306_v16 = vmul.f32 %v522_v14, %v298_v8 }
 0x1ac   : > { %v314_v18 = vmul.f32 %v453_v15, %v306_v16 }
 0x1ae   : > { %v322_v19 = vadd.f32 %v454_v17, %v314_v18 }
 0x1b0   : > { %v323_v20 = vpack.c.bf16 %v322_v19, %v322_v19 }
 0x1b2   : > { %325 = vst.msk [vmem:[%s286_s13] sm:$0xf] %vm324_vm1, %v323_v20 }
 0x1b3   : > { %624 = shalt.err (!%p621_p5)
}
 0x1b4   : > { %s625_s29 = scalar_lea.hbm %s924_s23, 64  ;;  %s629_s28 = scalar_lea.hbm %s973_s5, 128 }
 0x1b5   : > { %p626_p8 = scmp.ne.s32.totalorder %s924_s23, %s625_s29  ;;  %p630_p10 = scmp.lt.u32.totalorder %s924_s23, %s973_s5 }
 0x1b6   : > { %p631_p9 = scmp.lt.u32.totalorder %s629_s28, %s625_s29  ;;  %p633_p6 = scmp.lt.u32.totalorder %s625_s29, %s924_s23 }
 0x1b7   : > { %p627_p7 = pnand %p626_p8, %p992_p12 }
 0x1b8   : > { %p632_p0 = por %p631_p9, %p630_p10 }
 0x1b9   : > { %p628_p4 = pneg %p627_p7 }
 0x1ba   : > { %p634_p1 = por %p633_p6, %p632_p0 }
 0x1bc   : > { %p635_p11 = pnand %p634_p1, %p628_p4 }
 0x1be   : > { %638 = shalt.err (!%p635_p11)
}
 0x1bf   : > { %467 = dma.vmem_to_hbm [thread:$0]  (%p992_p12), %s926_s16, 64, %s924_s23, %s327_s26  }
 0x1c0 PF: > { %s352_s11 = sand.u32 1, %s673_s18   ;;  %p993_p13 = scmp.ne.s32.totalorder %s982_s9, 0 }
 0x1c1   : > { %p994_p3 = scmp.ge.s32.totalorder %s685_s21, 2  ;;  %s353_s13 = scalar_lea.sflag [#allocation4], %s352_s11 }
 0x1c3   : > { %p481_p2 = pnand %p994_p3, %p993_p13 }
 0x1c5   : > { %668 = dma.done.wait (!%p481_p2), %s353_s13, 64  }
 0x1c6   : > { %670 = vsyncadd (!%p481_p2), %s353_s13, 4294967232  ;;  %p19_p5 = scmp.ge.s32.totalorder %s742_s22, 4   ;;  %s995_s18 = smov %s677_s19 }
 0x1c7   : > { %s996_s19 = smov %s681_s20  ;;  %s997_s20 = smov %s753_s25 }
 0x1c8   : > { %s998_s21 = smov %s742_s22  ;;  %21 = sbr.rel (!%p19_p5) target bundleno = 6 (0x6), region = 100 }
 0x1cf   :  { %358 = vsyncpa [#allocation3], 1 }
 0x1d0   :  { %360 = vsyncpa [#allocation3 + $0x1], 1 }
 0x1d1   :  { %361 = vsyncpa [#allocation6], 1 }
 0x1d2   :  { %362 = vsyncpa [#allocation4], 1 }
 0x1d3   :  { %364 = vsyncpa [#allocation4 + $0x1], 1 }

</bundles_post_ra>
